<compile_context>
chip_gen: v6e
topology: v6e:2x2x1
jax: 0.10.0
libtpu: 0.0.40
codegen_flags: <defaults>
</compile_context>

<pallas_src>
import jax
import jax.numpy as jnp
from jax.experimental import pallas as pl
from jax.experimental.pallas import tpu as pltpu


def mlp_fused_kernel(xflat_ref, yflat_ref, w1s_ref, b1_ref, w2_ref, b2_ref,
                     whyblk_ref, whct_ref, bh_ref, out_ref):
    # ----- pooling + first linear fused into one lane-dense matmul ----------
    # xflat: (bb, L_in*d_in) bf16, w1s: (L_in*d_in, h1) bf16 (1/L_in folded,
    # w1 replicated L_in times along K).
    h1 = jnp.dot(xflat_ref[...], w1s_ref[...],
                 preferred_element_type=jnp.float32)               # (bb, h1)
    h1 = jnp.maximum(h1 + b1_ref[...], 0.0)                        # f32 VPU

    h2 = jnp.dot(h1.astype(jnp.bfloat16), w2_ref[...],
                 preferred_element_type=jnp.float32)               # (bb, h2)
    ctx = jnp.maximum(h2 + b2_ref[...], 0.0)

    # ----- head, split along the concat axis --------------------------------
    # ctx part : (bb, h2) @ (h2, 1)                                  -> (bb, 1)
    # yemb part: (bb, L_out*d_emb) @ blockdiag(L_out*d_emb, L_out)   -> (bb, L_out)
    cterm = jnp.dot(ctx.astype(jnp.bfloat16), whct_ref[...],
                    preferred_element_type=jnp.float32)
    yterm = jnp.dot(yflat_ref[...], whyblk_ref[...],
                    preferred_element_type=jnp.float32)

    # Lane-dense output layout (L_out, bb): unmasked full-vreg stores when bb
    # is a multiple of 128.  The (bb, L_out) -> (L_out, bb) transpose is a tiny
    # XLU op off the MXU/DMA critical path.
    out_ref[...] = (yterm + cterm + bh_ref[0, 0]).T


def _pick_block_b(B):
    """Adaptive batch tile.

    Must be a multiple of 128 (lane dim of the transposed output block) or
    equal to B.  Targets large tiles (overhead amortization) while keeping the
    grid length >= 2 (>= 4 when B allows) so both v7x TCs get pipelined work.
    """
    if B <= 256:
        if B == 256:
            return 128                      # nb = 2: one tile per v7x core
        return B                            # single full-batch block
    bb = (B // 4) // 128 * 128              # aim for ~4 grid steps
    return max(128, min(bb, 1024))          # cap at 1024 rows per tile


def _act_spec(block_shape, nb):
    """Activation BlockSpec; 3-deep buffering when the grid is long enough."""
    idx = lambda i: (i, 0)
    if nb >= 3:
        try:
            return pl.BlockSpec(block_shape, idx, pipeline_mode=pl.Buffered(3))
        except TypeError:                   # older jax without pipeline_mode
            pass
    return pl.BlockSpec(block_shape, idx)


def mlp_forward(Xemb, yemb, w1, b1, w2, b2, why, whc, bh, *, block_b=None):
    B, L_in, d_in = Xemb.shape
    _, L_out, d_emb = yemb.shape
    h1_dim = w1.shape[1]
    h2_dim = w2.shape[1]
    Kx = L_in * d_in
    Ky = L_out * d_emb

    bb = _pick_block_b(B) if block_b is None else min(block_b, B)
    nb = pl.cdiv(B, bb)

    # ---- one-time parameter / activation preprocessing (plain JAX) ---------
    # fold mean scale into w1 and replicate along K so pooling fuses into the
    # first matmul; build block-diagonal head weight for the yemb term;
    # bf16 for every MXU operand.
    w1s = jnp.tile(w1 * (1.0 / L_in), (L_in, 1)).astype(jnp.bfloat16)   # (Kx, h1)
    w2b = w2.astype(jnp.bfloat16)                                       # (h1, h2)
    whct = whc.T.astype(jnp.bfloat16)                                   # (h2, 1)
    eye = jnp.eye(L_out, dtype=jnp.float32)                             # (L_out, L_out)
    whyblk = (eye[:, None, :] * why[0][None, :, None]).reshape(Ky, L_out)
    whyblk = whyblk.astype(jnp.bfloat16)                                # (Ky, L_out)

    xflat = Xemb.reshape(B, Kx).astype(jnp.bfloat16)                    # (B, Kx)
    yflat = yemb.reshape(B, Ky).astype(jnp.bfloat16)                    # (B, Ky)
    b1f = b1.astype(jnp.float32)                                        # (1, h1)
    b2f = b2.astype(jnp.float32)                                        # (1, h2)
    bhf = bh.astype(jnp.float32).reshape(1, 1)                          # scalar -> SMEM

    flops = 2 * B * (Kx * h1_dim + h1_dim * h2_dim + h2_dim + Ky * L_out)
    bytes_accessed = (xflat.size * 2 + yflat.size * 2
                      + (w1s.size + w2b.size + whct.size + whyblk.size) * 2
                      + (b1f.size + b2f.size + bhf.size) * 4
                      + B * L_out * 4)

    const2 = lambda i: (0, 0)          # weights: constant block -> VMEM resident

    out_t = pl.pallas_call(
        mlp_fused_kernel,
        out_shape=jax.ShapeDtypeStruct((L_out, B), jnp.float32),
        grid=(nb,),
        in_specs=[
            _act_spec((bb, Kx), nb),                              # xflat
            _act_spec((bb, Ky), nb),                              # yflat
            pl.BlockSpec((Kx, h1_dim), const2),                   # w1s
            pl.BlockSpec((1, h1_dim), const2),                    # b1
            pl.BlockSpec((h1_dim, h2_dim), const2),               # w2
            pl.BlockSpec((1, h2_dim), const2),                    # b2
            pl.BlockSpec((Ky, L_out), const2),                    # whyblk
            pl.BlockSpec((h2_dim, 1), const2),                    # whct
            pl.BlockSpec(memory_space=pltpu.MemorySpace.SMEM),    # bh scalar
        ],
        out_specs=pl.BlockSpec((L_out, bb), lambda i: (0, i)),
        compiler_params=pltpu.CompilerParams(
            dimension_semantics=("parallel",),
            vmem_limit_bytes=32 * 1024 * 1024),
        cost_estimate=pl.CostEstimate(flops=flops, transcendentals=0,
                                      bytes_accessed=bytes_accessed),
    )(xflat, yflat, w1s, b1f, w2b, b2f, whyblk, whct, bhf)

    return out_t.T                                                # (B, L_out)


def reference_forward(Xemb, yemb, w1, b1, w2, b2, why, whc, bh):
    """Pure-JAX f32 reference mirroring the PyTorch module exactly."""
    pooled = Xemb.mean(axis=1)
    h1 = jnp.maximum(pooled @ w1 + b1, 0.0)
    ctx = jnp.maximum(h1 @ w2 + b2, 0.0)
    L_out = yemb.shape[1]
    ctx_exp = jnp.broadcast_to(ctx[:, None, :], (ctx.shape[0], L_out, ctx.shape[1]))
    z = jnp.concatenate([yemb, ctx_exp], axis=-1)
    wh = jnp.concatenate([why, whc], axis=-1)            # (1, d_emb + h2)
    out = z @ wh.T + bh[0]                               # (B, L_out, 1)
    return out[..., 0]


if __name__ == "__main__":
    # small shapes consistent with the module's forward
    B, L_in, L_out = 2, 16, 8
    F_in, F_trg = 4, 4            # raw feature dims fed to the embeddings
    d_in, d_emb = 32, 32
    h1_dim, h2_dim = 64, 64       # hidden=[64, 64]
    d_out = 1

    key = jax.random.PRNGKey(0)
    keys = jax.random.split(key, 16)

    # raw inputs (as the PyTorch module receives them)
    X = jax.random.normal(keys[0], (B, L_in, F_in), jnp.float32)
    y = jax.random.normal(keys[1], (B, L_out, F_trg), jnp.float32)

    # deterministic stand-in ModularEmbedding weights (plain-JAX glue)
    We_in = jax.random.normal(keys[2], (F_in, d_in), jnp.float32) * 0.1
    We_trg = jax.random.normal(keys[3], (F_trg, d_emb), jnp.float32) * 0.1
    Xemb = X @ We_in                                     # (B, L_in,  d_in)
    yemb = y @ We_trg                                    # (B, L_out, d_emb)

    # MLP + head parameters (deterministic init)
    w1 = jax.random.normal(keys[4], (d_in, h1_dim), jnp.float32) * 0.1
    b1 = jax.random.normal(keys[5], (1, h1_dim), jnp.float32) * 0.1
    w2 = jax.random.normal(keys[6], (h1_dim, h2_dim), jnp.float32) * 0.1
    b2 = jax.random.normal(keys[7], (1, h2_dim), jnp.float32) * 0.1
    # head weight W: (d_out=1, d_emb + h2) split along the concat axis
    why = jax.random.normal(keys[8], (d_out, d_emb), jnp.float32) * 0.1   # yemb part
    whc = jax.random.normal(keys[9], (d_out, h2_dim), jnp.float32) * 0.1  # ctx part
    bh = jax.random.normal(keys[10], (1, 1), jnp.float32) * 0.1

    # ---- small-shape check: single full-batch block (grid=(1,)) ------------
    out = jax.block_until_ready(mlp_forward(Xemb, yemb, w1, b1, w2, b2, why, whc, bh))
    ref = reference_forward(Xemb, yemb, w1, b1, w2, b2, why, whc, bh)
    assert out.shape == (B, L_out), out.shape
    assert jnp.allclose(out, ref, atol=3e-2, rtol=3e-2), (out, ref)

    # ---- B=256: bb=128, nb=2 -> both v7x cores get one tile each -----------
    B2 = 256
    X2 = jax.random.normal(keys[11], (B2, L_in, F_in), jnp.float32)
    y2 = jax.random.normal(keys[12], (B2, L_out, F_trg), jnp.float32)
    Xemb2, yemb2 = X2 @ We_in, y2 @ We_trg
    out2 = jax.block_until_ready(mlp_forward(Xemb2, yemb2, w1, b1, w2, b2, why, whc, bh))
    ref2 = reference_forward(Xemb2, yemb2, w1, b1, w2, b2, why, whc, bh)
    assert out2.shape == (B2, L_out), out2.shape
    assert jnp.allclose(out2, ref2, atol=3e-2, rtol=3e-2), (out2, ref2)

    # ---- B=512: bb=128, nb=4 -> exercises pipelining + Buffered(3) path ----
    B3 = 512
    X3 = jax.random.normal(keys[13], (B3, L_in, F_in), jnp.float32)
    y3 = jax.random.normal(keys[14], (B3, L_out, F_trg), jnp.float32)
    Xemb3, yemb3 = X3 @ We_in, y3 @ We_trg
    out3 = jax.block_until_ready(mlp_forward(Xemb3, yemb3, w1, b1, w2, b2, why, whc, bh))
    ref3 = reference_forward(Xemb3, yemb3, w1, b1, w2, b2, why, whc, bh)
    assert out3.shape == (B3, L_out), out3.shape
    assert jnp.allclose(out3, ref3, atol=3e-2, rtol=3e-2), (out3, ref3)

    print("KERNEL_OK")
</pallas_src>

<mosaic_0001>
module attributes {stable_mosaic.version = 11 : i64} {
  func.func @mlp_fused_kernel(%arg0: i32, %arg1: memref<2x512xbf16, #tpu.memory_space<vmem>>, %arg2: memref<2x256xbf16, #tpu.memory_space<vmem>>, %arg3: memref<512x64xbf16, #tpu.memory_space<vmem>>, %arg4: memref<1x64xf32, #tpu.memory_space<vmem>>, %arg5: memref<64x64xbf16, #tpu.memory_space<vmem>>, %arg6: memref<1x64xf32, #tpu.memory_space<vmem>>, %arg7: memref<256x8xbf16, #tpu.memory_space<vmem>>, %arg8: memref<64x1xbf16, #tpu.memory_space<vmem>>, %arg9: memref<1x1xf32, #tpu.memory_space<smem>>, %arg10: memref<8x2xf32, #tpu.memory_space<vmem>>) attributes {dimension_semantics = [#tpu.dimension_semantics<parallel>], iteration_bounds = array<i64: 1>, scalar_prefetch = 0 : i64, scratch_operands = 0 : i64, tpu.core_type = #tpu.core_type<tc>, window_params = [{transform_indices = @transform_0, window_bounds = array<i64: 2, 512>}, {transform_indices = @transform_1, window_bounds = array<i64: 2, 256>}, {pipeline_mode = #tpu.pipeline_mode<synchronous>, transform_indices = @transform_2, window_bounds = array<i64: 512, 64>}, {pipeline_mode = #tpu.pipeline_mode<synchronous>, transform_indices = @transform_3, window_bounds = array<i64: 1, 64>}, {pipeline_mode = #tpu.pipeline_mode<synchronous>, transform_indices = @transform_4, window_bounds = array<i64: 64, 64>}, {pipeline_mode = #tpu.pipeline_mode<synchronous>, transform_indices = @transform_5, window_bounds = array<i64: 1, 64>}, {pipeline_mode = #tpu.pipeline_mode<synchronous>, transform_indices = @transform_6, window_bounds = array<i64: 256, 8>}, {pipeline_mode = #tpu.pipeline_mode<synchronous>, transform_indices = @transform_7, window_bounds = array<i64: 64, 1>}, {transform_indices = @transform_8, window_bounds = array<i64: 1, 1>}, {transform_indices = @transform_9, window_bounds = array<i64: 8, 2>}]} {
    %c0 = arith.constant 0 : index
    %c0_0 = arith.constant 0 : index
    %0 = vector.load %arg1[%c0, %c0_0] : memref<2x512xbf16, #tpu.memory_space<vmem>>, vector<2x512xbf16>
    %c0_1 = arith.constant 0 : index
    %c0_2 = arith.constant 0 : index
    %1 = vector.load %arg3[%c0_1, %c0_2] : memref<512x64xbf16, #tpu.memory_space<vmem>>, vector<512x64xbf16>
    %cst = arith.constant dense<0.000000e+00> : vector<2x64xf32>
    %2 = tpu.matmul %0, %1, %cst {dimension_numbers = #tpu.dot_dimension_numbers<[1], [0], [0], [1], [0, 0, 1, 1], [], []>} : vector<2x512xbf16>, vector<512x64xbf16>, vector<2x64xf32> -> vector<2x64xf32>
    %c0_3 = arith.constant 0 : index
    %c0_4 = arith.constant 0 : index
    %3 = vector.load %arg4[%c0_3, %c0_4] : memref<1x64xf32, #tpu.memory_space<vmem>>, vector<1x64xf32>
    %4 = vector.broadcast %3 : vector<1x64xf32> to vector<2x64xf32>
    %5 = arith.addf %2, %4 : vector<2x64xf32>
    %cst_5 = arith.constant 0.000000e+00 : f32
    %6 = vector.broadcast %cst_5 : f32 to vector<2x64xf32>
    %7 = arith.maximumf %5, %6 : vector<2x64xf32>
    %8 = arith.truncf %7 : vector<2x64xf32> to vector<2x64xbf16>
    %c0_6 = arith.constant 0 : index
    %c0_7 = arith.constant 0 : index
    %9 = vector.load %arg5[%c0_6, %c0_7] : memref<64x64xbf16, #tpu.memory_space<vmem>>, vector<64x64xbf16>
    %cst_8 = arith.constant dense<0.000000e+00> : vector<2x64xf32>
    %10 = tpu.matmul %8, %9, %cst_8 {dimension_numbers = #tpu.dot_dimension_numbers<[1], [0], [0], [1], [0, 0, 1, 1], [], []>} : vector<2x64xbf16>, vector<64x64xbf16>, vector<2x64xf32> -> vector<2x64xf32>
    %c0_9 = arith.constant 0 : index
    %c0_10 = arith.constant 0 : index
    %11 = vector.load %arg6[%c0_9, %c0_10] : memref<1x64xf32, #tpu.memory_space<vmem>>, vector<1x64xf32>
    %12 = vector.broadcast %11 : vector<1x64xf32> to vector<2x64xf32>
    %13 = arith.addf %10, %12 : vector<2x64xf32>
    %cst_11 = arith.constant 0.000000e+00 : f32
    %14 = vector.broadcast %cst_11 : f32 to vector<2x64xf32>
    %15 = arith.maximumf %13, %14 : vector<2x64xf32>
    %16 = arith.truncf %15 : vector<2x64xf32> to vector<2x64xbf16>
    %c0_12 = arith.constant 0 : index
    %c0_13 = arith.constant 0 : index
    %17 = vector.load %arg8[%c0_12, %c0_13] : memref<64x1xbf16, #tpu.memory_space<vmem>>, vector<64x1xbf16>
    %cst_14 = arith.constant dense<0.000000e+00> : vector<2x1xf32>
    %18 = tpu.matmul %16, %17, %cst_14 {dimension_numbers = #tpu.dot_dimension_numbers<[1], [0], [0], [1], [0, 0, 1, 1], [], []>} : vector<2x64xbf16>, vector<64x1xbf16>, vector<2x1xf32> -> vector<2x1xf32>
    %c0_15 = arith.constant 0 : index
    %c0_16 = arith.constant 0 : index
    %19 = vector.load %arg2[%c0_15, %c0_16] : memref<2x256xbf16, #tpu.memory_space<vmem>>, vector<2x256xbf16>
    %c0_17 = arith.constant 0 : index
    %c0_18 = arith.constant 0 : index
    %20 = vector.load %arg7[%c0_17, %c0_18] : memref<256x8xbf16, #tpu.memory_space<vmem>>, vector<256x8xbf16>
    %cst_19 = arith.constant dense<0.000000e+00> : vector<2x8xf32>
    %21 = tpu.matmul %19, %20, %cst_19 {dimension_numbers = #tpu.dot_dimension_numbers<[1], [0], [0], [1], [0, 0, 1, 1], [], []>} : vector<2x256xbf16>, vector<256x8xbf16>, vector<2x8xf32> -> vector<2x8xf32>
    %22 = vector.broadcast %18 : vector<2x1xf32> to vector<2x8xf32>
    %23 = arith.addf %21, %22 : vector<2x8xf32>
    %c0_20 = arith.constant 0 : index
    %c0_21 = arith.constant 0 : index
    %24 = memref.load %arg9[%c0_20, %c0_21] : memref<1x1xf32, #tpu.memory_space<smem>>
    %25 = vector.broadcast %24 : f32 to vector<2x8xf32>
    %26 = arith.addf %23, %25 : vector<2x8xf32>
    %27 = tpu.transpose %26, [1, 0] : vector<2x8xf32> -> vector<8x2xf32>
    %c0_22 = arith.constant 0 : index
    %c0_23 = arith.constant 0 : index
    %28 = vector.load %arg10[%c0_22, %c0_23] : memref<8x2xf32, #tpu.memory_space<vmem>>, vector<8x2xf32>
    tpu.vector_store %arg10[%c0_22, %c0_23], %27 {strides = array<i32>} : memref<8x2xf32, #tpu.memory_space<vmem>>, vector<8x2xf32>,
    return
  }
  func.func @transform_0(%arg0: i32) -> (i32, i32) {
    %c0_i32 = arith.constant 0 : i32
    %c0_i32_0 = arith.constant 0 : i32
    return %arg0, %c0_i32 : i32, i32
  }
  func.func @transform_1(%arg0: i32) -> (i32, i32) {
    %c0_i32 = arith.constant 0 : i32
    %c0_i32_0 = arith.constant 0 : i32
    return %arg0, %c0_i32 : i32, i32
  }
  func.func @transform_2(%arg0: i32) -> (i32, i32) {
    %c0_i32 = arith.constant 0 : i32
    %c0_i32_0 = arith.constant 0 : i32
    %c0_i32_1 = arith.constant 0 : i32
    return %c0_i32, %c0_i32_0 : i32, i32
  }
  func.func @transform_3(%arg0: i32) -> (i32, i32) {
    %c0_i32 = arith.constant 0 : i32
    %c0_i32_0 = arith.constant 0 : i32
    %c0_i32_1 = arith.constant 0 : i32
    return %c0_i32, %c0_i32_0 : i32, i32
  }
  func.func @transform_4(%arg0: i32) -> (i32, i32) {
    %c0_i32 = arith.constant 0 : i32
    %c0_i32_0 = arith.constant 0 : i32
    %c0_i32_1 = arith.constant 0 : i32
    return %c0_i32, %c0_i32_0 : i32, i32
  }
  func.func @transform_5(%arg0: i32) -> (i32, i32) {
    %c0_i32 = arith.constant 0 : i32
    %c0_i32_0 = arith.constant 0 : i32
    %c0_i32_1 = arith.constant 0 : i32
    return %c0_i32, %c0_i32_0 : i32, i32
  }
  func.func @transform_6(%arg0: i32) -> (i32, i32) {
    %c0_i32 = arith.constant 0 : i32
    %c0_i32_0 = arith.constant 0 : i32
    %c0_i32_1 = arith.constant 0 : i32
    return %c0_i32, %c0_i32_0 : i32, i32
  }
  func.func @transform_7(%arg0: i32) -> (i32, i32) {
    %c0_i32 = arith.constant 0 : i32
    %c0_i32_0 = arith.constant 0 : i32
    %c0_i32_1 = arith.constant 0 : i32
    return %c0_i32, %c0_i32_0 : i32, i32
  }
  func.func @transform_8(%arg0: i32) -> (i32, i32) {
    %c0_i32 = arith.constant 0 : i32
    %c0_i32_0 = arith.constant 0 : i32
    %c0_i32_1 = arith.constant 0 : i32
    return %c0_i32, %c0_i32_0 : i32, i32
  }
  func.func @transform_9(%arg0: i32) -> (i32, i32) {
    %c0_i32 = arith.constant 0 : i32
    %c0_i32_0 = arith.constant 0 : i32
    return %c0_i32, %arg0 : i32, i32
  }
}

</mosaic_0001>

<bundles_post_ra>
// kernel: tpu_custom_call.1
= control target key start
LH: loop header
LB: loop body
LE: loop exit
PB: predicated region body
PF: predicated region fallthrough
CT: control target
= control target key end

     0   :  { %v1032_v22 = vmov 1966171168   ;;  %v118_v24 = vlaneseq  ;;  %v1033_v41 = vmov 0.0   ;;  %vm1034_vm0 = vmmov 0   ;;  %s1282_s2 = inlined_call_operand.vmem [shape: bf16[512,64], index: 2, kind: input, shape index: {}]   ;;  %s1283_s0 = inlined_call_operand.vmem [shape: bf16[2,512], index: 0, kind: input, shape index: {}]   ;;  %s1284_s4 = inlined_call_operand.vmem [shape: bf16[64,64], index: 4, kind: input, shape index: {}]   ;;  %s1285_s7 = inlined_call_operand.vmem [shape: bf16[64,1], index: 7, kind: input, shape index: {}]   ;;  %s1286_s3 = inlined_call_operand.vmem [shape: f32[1,64], index: 3, kind: input, shape index: {}]   ;;  %s1287_s6 = inlined_call_operand.vmem [shape: bf16[256,8], index: 6, kind: input, shape index: {}]   ;;  %s1288_s1 = inlined_call_operand.vmem [shape: bf16[2,256], index: 1, kind: input, shape index: {}]   ;;  %s1289_s5 = inlined_call_operand.vmem [shape: f32[1,64], index: 5, kind: input, shape index: {}]   ;;  %s1290_s8 = inlined_call_operand.<no memory space> [shape: f32[1,1], index: 8, kind: input, shape index: {}]   ;;  %s1291_s9 = inlined_call_operand.vmem [shape: f32[8,2], index: 9, kind: output, shape index: {}]  }
   0x1   :  { %v976_v0 = vld [vmem:[%s1282_s2 + $0x78] sm:$0xff]   ;;  %v980_v4 = vld [vmem:[%s1282_s2 + $0x70] sm:$0xff]   ;;  %v984_v8 = vld [vmem:[%s1282_s2 + $0x68] sm:$0xff]   ;;  %v116_v23 = vunpack.c.l.s4 %v1032_v22  ;;  %vm448_vm1 = vcmask 523264   ;;  %vm803_vm2 = vcmask 15360  }
   0x2   :  { %v977_v1 = vld [vmem:[%s1282_s2 + $0xf8] sm:$0xff]   ;;  %871 = vmatprep.subr.bf16.mxu0 %v976_v0  ;;  %v981_v5 = vld [vmem:[%s1282_s2 + $0xf0] sm:$0xff]   ;;  %v985_v9 = vld [vmem:[%s1282_s2 + $0xe8] sm:$0xff]   ;;  %v119_v30 = vshrl.u32 %v118_v24, 7 }
   0x3   :  { %v978_v2 = vld [vmem:[%s1282_s2 + $0x38] sm:$0xff]   ;;  %893 = vmatprep.subr.bf16.mxu1 %v977_v1  ;;  %v982_v6 = vld [vmem:[%s1282_s2 + $0x30] sm:$0xff]   ;;  %v986_v10 = vld [vmem:[%s1282_s2 + $0x28] sm:$0xff]   ;;  %v117_v29 = vunpack.c.0.s8 %v116_v23 }
   0x4   :  { %v979_v3 = vld [vmem:[%s1282_s2 + $0xb8] sm:$0xff]   ;;  %872 = vmatpush3.bf16.msra.mxu0 %v978_v2  ;;  %v983_v7 = vld [vmem:[%s1282_s2 + $0xb0] sm:$0xff]   ;;  %v987_v11 = vld [vmem:[%s1282_s2 + $0xa8] sm:$0xff]  }
   0x5   :  { %894 = vmatpush3.bf16.msra.mxu1 %v979_v3  ;;  %873 = vmatprep.subr.bf16.mxu0 %v980_v4  ;;  %v988_v12 = vld [vmem:[%s1282_s2 + $0x60] sm:$0xff]   ;;  %v992_v16 = vld [vmem:[%s1282_s2 + $0x58] sm:$0xff]   ;;  %v996_v20 = vld [vmem:[%s1282_s2 + $0x50] sm:$0xff]   ;;  %v1176_v35 = vsub.s32 %v117_v29, %v119_v30 }
   0x6   :  { %895 = vmatprep.subr.bf16.mxu1 %v981_v5  ;;  %v989_v13 = vld [vmem:[%s1282_s2 + $0xe0] sm:$0xff]   ;;  %v993_v17 = vld [vmem:[%s1282_s2 + $0xd8] sm:$0xff]   ;;  %v997_v21 = vld [vmem:[%s1282_s2 + $0xd0] sm:$0xff]   ;;  %v1035_v5 = vmov 0  }
   0x7   :  { %v990_v14 = vld [vmem:[%s1282_s2 + $0x20] sm:$0xff]   ;;  %v994_v18 = vld [vmem:[%s1282_s2 + $0x18] sm:$0xff]   ;;  %v998_v25 = vld [vmem:[%s1282_s2 + $0x10] sm:$0xff]   ;;  %975 = vset.pattern.permute.xlu0 %v1035_v5 }
   0x8   :  { %874 = vmatpush3.bf16.msra.mxu0 %v982_v6  ;;  %v991_v15 = vld [vmem:[%s1282_s2 + $0xa0] sm:$0xff]   ;;  %v995_v19 = vld [vmem:[%s1282_s2 + $0x98] sm:$0xff]   ;;  %v999_v26 = vld [vmem:[%s1282_s2 + $0x90] sm:$0xff]  }
   0x9   :  { %896 = vmatpush3.bf16.msra.mxu1 %v983_v7  ;;  %875 = vmatprep.subr.bf16.mxu0 %v984_v8  ;;  %v1000_v27 = vld [vmem:[%s1282_s2 + $0x48] sm:$0xff]   ;;  %v1004_v33 = vld [vmem:[%s1282_s2 + $0x40] sm:$0xff]   ;;  %v1008_v45 = vld [vmem:[%s1284_s4 + $0x18] sm:$0xff]  }
   0xa   :  { %897 = vmatprep.subr.bf16.mxu1 %v985_v9  ;;  %v1001_v28 = vld [vmem:[%s1282_s2 + $0xc8] sm:$0xff]   ;;  %v1005_v34 = vld [vmem:[%s1282_s2 + $0xc0] sm:$0xff]   ;;  %v1009_v46 = vld [vmem:[%s1284_s4 + $0x10] sm:$0xff]  }
   0xb   :  { %v1002_v31 = vld [vmem:[%s1282_s2 + $0x8] sm:$0xff]   ;;  %v1006_v36 = vld [vmem:[%s1282_s2] sm:$0xff]   ;;  %v1012_v63 = vld [vmem:[%s1285_s7 + $0x18] sm:$0xff]  }
   0xc   :  { %876 = vmatpush3.bf16.msra.mxu0 %v986_v10  ;;  %v1003_v32 = vld [vmem:[%s1282_s2 + $0x88] sm:$0xff]   ;;  %v1007_v37 = vld [vmem:[%s1282_s2 + $0x80] sm:$0xff]   ;;  %v1013_v1 = vld [vmem:[%s1285_s7 + $0x10] sm:$0xff]  }
   0xd   :  { %898 = vmatpush3.bf16.msra.mxu1 %v987_v11  ;;  %877 = vmatprep.subr.bf16.mxu0 %v988_v12  ;;  %v810_v38 = vld.sshfl [vmem:[%s1283_s0] sm:$0x33 pattern:$0x75316420]  ;;  %v1010_v47 = vld [vmem:[%s1284_s4 + $0x8] sm:$0xff]   ;;  %v1016_v4 = vld [vmem:[%s1287_s6 + $0x78] sm:$0xff]  }
   0xe   :  { %899 = vmatprep.subr.bf16.mxu1 %v989_v13  ;;  %v114_v39 = vcombine.high %v810_v38, %v810_v38  ;;  %v121_v40 = vrot.slane %v810_v38, %v1176_v35  ;;  %v1011_v48 = vld [vmem:[%s1284_s4] sm:$0xff]   ;;  %v1014_v2 = vld [vmem:[%s1285_s7 + $0x8] sm:$0xff]   ;;  %v1017_v6 = vld [vmem:[%s1287_s6 + $0x38] sm:$0xff]  }
   0xf   :  { %v809_v51 = vld [vmem:[%s1286_s3] ss:$0 sm:$0xff]  ;;  %v1018_v7 = vld [vmem:[%s1287_s6 + $0x70] sm:$0xff]   ;;  %v1020_v9 = vld [vmem:[%s1287_s6 + $0x68] sm:$0xff]  }
  0x10   :  { %878 = vmatpush3.bf16.msra.mxu0 %v990_v14  ;;  %v128_v42 = vrot.slane %v114_v39, %v1176_v35  ;;  %v129_v43 = vcombine.high %v121_v40, %v121_v40  ;;  %v1015_v3 = vld [vmem:[%s1285_s7] sm:$0xff]   ;;  %v1019_v8 = vld [vmem:[%s1287_s6 + $0x30] sm:$0xff]   ;;  %v1021_v10 = vld [vmem:[%s1287_s6 + $0x28] sm:$0xff]  }
  0x11   :  { %900 = vmatpush3.bf16.msra.mxu1 %v991_v15  ;;  %879 = vmatprep.subr.bf16.mxu0 %v992_v16  ;;  %v1022_v11 = vld [vmem:[%s1287_s6 + $0x60] sm:$0xff]   ;;  %v1024_v13 = vld [vmem:[%s1287_s6 + $0x58] sm:$0xff]   ;;  %v1026_v15 = vld [vmem:[%s1287_s6 + $0x50] sm:$0xff]  }
  0x12   :  { %901 = vmatprep.subr.bf16.mxu1 %v993_v17  ;;  %359 = vmatprep.mubr.bf16.mxu0 %v128_v42  ;;  %v130_v44 = vcombine.high %v128_v42, %v128_v42  ;;  %v1023_v12 = vld [vmem:[%s1287_s6 + $0x20] sm:$0xff]   ;;  %v1025_v14 = vld [vmem:[%s1287_s6 + $0x18] sm:$0xff]   ;;  %v769_v42 = vstv %s1290_s8 }
  0x13   :  { %v854_v16 = vld.sshfl [vmem:[%s1288_s1] sm:$0x11 pattern:$0x75316420] }
  0x14   :  { %880 = vmatpush3.bf16.msra.mxu0 %v994_v18  ;;  %399 = vmatprep.mubr.bf16.mxu1 %v130_v44  ;;  %v615_v17 = vcombine.high %v854_v16, %v854_v16  ;;  %v1027_v18 = vld [vmem:[%s1287_s6 + $0x10] sm:$0xff]   ;;  %v1030_v22 = vld [vmem:[%s1287_s6 + $0x40] sm:$0xff]   ;;  %v622_v24 = vrot.slane %v854_v16, %v1176_v35 }
  0x15   :  { %902 = vmatpush3.bf16.msra.mxu1 %v995_v19  ;;  %881 = vmatprep.subr.bf16.mxu0 %v996_v20  ;;  %v1028_v20 = vld [vmem:[%s1287_s6 + $0x48] sm:$0xff]   ;;  %v1031_v23 = vld [vmem:[%s1287_s6] sm:$0xff]  }
  0x16   :  { %903 = vmatprep.subr.bf16.mxu1 %v997_v21  ;;  %v629_v19 = vrot.slane %v615_v17, %v1176_v35  ;;  %v1029_v21 = vld [vmem:[%s1287_s6 + $0x8] sm:$0xff]  }
  0x18   :  { %882 = vmatpush3.bf16.msra.mxu0 %v998_v25  ;;  %v843_v25 = vld [vmem:[%s1289_s5] ss:$0 sm:$0xff] }
  0x19   :  { %904 = vmatpush3.bf16.msra.mxu1 %v999_v26  ;;  %883 = vmatprep.subr.bf16.mxu0 %v1000_v27 }
  0x1a   :  { %905 = vmatprep.subr.bf16.mxu1 %v1001_v28 }
  0x1c   :  { %884 = vmatpush3.bf16.msra.mxu0 %v1002_v31 }
  0x1d   :  { %906 = vmatpush3.bf16.msra.mxu1 %v1003_v32  ;;  %885 = vmatprep.subr.bf16.mxu0 %v1004_v33 }
  0x1e   :  { %907 = vmatprep.subr.bf16.mxu1 %v1005_v34 }
  0x20   :  { %886 = vmatpush3.bf16.msra.mxu0 %v1006_v36 }
  0x21   :  { %908 = vmatpush3.bf16.msra.mxu1 %v1007_v37  ;;  %925 = vmatprep.subr.bf16.mxu0 %v1016_v4 }
  0x22   :  { %947 = vmatprep.subr.bf16.mxu1 %v1033_v41 }
  0x23   :  { %360 = vmatmul.mubr.bf16.vlgmr.msra.gmra.mxu0 %v121_v40 }
  0x24   :  { %400 = vmatmul.mubr.bf16.vlgmr.msra.gmra.mxu1 %v129_v43  ;;  %926 = vmatpush3.bf16.msra.mxu0 %v1017_v6 }
  0x25   :  { %948 = vmatpush3.bf16.msra.mxu1 %v1008_v45  ;;  %955 = vmatprep.mubr.msk.bf16.mxu1 %vm1034_vm0, %v1033_v41 }
  0x26   :  { %949 = vmatprep.subr.bf16.mxu1 %v1033_v41  ;;  %927 = vmatprep.subr.bf16.mxu0 %v1018_v7 }
  0x27   :  { %760 = vmatprep.mubr.bf16.mxu0 %v629_v19 }
  0x28   :  { %928 = vmatpush3.bf16.msra.mxu0 %v1019_v8 }
  0x29   :  { %950 = vmatpush3.bf16.msra.mxu1 %v1009_v46  ;;  %929 = vmatprep.subr.bf16.mxu0 %v1020_v9 }
  0x2a   :  { %951 = vmatprep.subr.bf16.mxu1 %v1033_v41 }
  0x2c   :  { %930 = vmatpush3.bf16.msra.mxu0 %v1021_v10 }
  0x2d   :  { %952 = vmatpush3.bf16.msra.mxu1 %v1010_v47  ;;  %931 = vmatprep.subr.bf16.mxu0 %v1022_v11 }
  0x2e   :  { %953 = vmatprep.subr.bf16.mxu1 %v1033_v41 }
  0x30   :  { %932 = vmatpush3.bf16.msra.mxu0 %v1023_v12 }
  0x31   :  { %954 = vmatpush3.bf16.msra.mxu1 %v1011_v48  ;;  %933 = vmatprep.subr.bf16.mxu0 %v1024_v13 }
  0x32   :  { %959 = vmatprep.subr.bf16.mxu1 %v1033_v41 }
  0x34   :  { %934 = vmatpush3.bf16.msra.mxu0 %v1025_v14 }
  0x35   :  { %935 = vmatprep.subr.bf16.mxu0 %v1026_v15 }
  0x38   :  { %936 = vmatpush3.bf16.msra.mxu0 %v1027_v18 }
  0x39   :  { %937 = vmatprep.subr.bf16.mxu0 %v1028_v20 }
  0x3c   :  { %938 = vmatpush3.bf16.msra.mxu0 %v1029_v21 }
  0x3d   :  { %939 = vmatprep.subr.bf16.mxu0 %v1030_v22 }
  0x40   :  { %940 = vmatpush3.bf16.msra.mxu0 %v1031_v23 }
  0x43   :  { %761 = vmatmul.mubr.bf16.vlgmr.msra.gmra.mxu0 %v622_v24 }
  0xe3   :  { %v887_v49 = vpop.f32.mrf.mxu0 }
  0xe4   :  { %v909_v50 = vpop.f32.mrf.mxu1 }
  0xe5   :  { %v888_v52 = vpop.f32.mrf.mxu0 }
  0xe6   :  { %v889_v53 = vadd.f32 %v888_v52, %v887_v49  ;;  %v910_v54 = vpop.f32.mrf.mxu1 }
  0xe7   :  { %v890_v55 = vpop.f32.mrf.mxu0  ;;  %v911_v57 = vadd.f32 %v910_v54, %v909_v50 }
  0xe8   :  { %v362_v56 = vadd.f32 %v889_v53, %v809_v51  ;;  %v912_v58 = vpop.f32.mrf.mxu1 }
  0xe9   :  { %v891_v59 = vpop.f32.mrf.mxu0 }
  0xea   :  { %v402_v60 = vadd.f32 %v911_v57, %v362_v56  ;;  %v913_v61 = vpop.f32.mrf.mxu1 }
  0xec   :  { %v407_v62 = vmax.f32 %v402_v60, 0.0 }
  0xee   :  { %v408_v0 = vpack.c.bf16 %v407_v62, %v407_v62 }
  0xf0   :  { %956 = vmatmul.mubr.msk.bf16.vlgmr.msra.gmra.mxu1 %vm448_vm1, %v408_v0 }
  0xf1   :  { %960 = vmatpush3.bf16.msra.mxu1 %v1012_v63  ;;  %967 = vmatprep.mubr.msk.bf16.mxu1 %vm1034_vm0, %v1033_v41 }
  0xf2   :  { %961 = vmatprep.subr.bf16.mxu1 %v1033_v41 }
  0xf5   :  { %962 = vmatpush3.bf16.msra.mxu1 %v1013_v1 }
  0xf6   :  { %963 = vmatprep.subr.bf16.mxu1 %v1033_v41 }
  0xf9   :  { %964 = vmatpush3.bf16.msra.mxu1 %v1014_v2 }
  0xfa   :  { %965 = vmatprep.subr.bf16.mxu1 %v1033_v41 }
  0xfd   :  { %966 = vmatpush3.bf16.msra.mxu1 %v1015_v3 }
 0x103   :  { %v941_v33 = vpop.f32.mrf.mxu0 }
 0x105   :  { %v942_v34 = vpop.f32.mrf.mxu0 }
 0x106   :  { %v943_v36 = vadd.f32 %v942_v34, %v941_v33 }
 0x107   :  { %v944_v37 = vpop.f32.mrf.mxu0 }
 0x109   :  { %v945_v35 = vpop.f32.mrf.mxu0 }
 0x1b0   :  { %v486_v26 = vpop.f32.mrf.mxu1 }
 0x1b1   :  { %v487_v27 = vadd.f32 %v843_v25, %v486_v26 }
 0x1b2   :  { %v957_v28 = vpop.f32.mrf.mxu1 }
 0x1b3   :  { %v492_v29 = vmax.f32 %v487_v27, 0.0 }
 0x1b4   :  { %v489_v30 = vpop.f32.mrf.mxu1 }
 0x1b5   :  { %v493_v31 = vpack.c.bf16 %v492_v29, %v492_v29 }
 0x1b6   :  { %v958_v32 = vpop.f32.mrf.mxu1 }
 0x1b7   :  { %968 = vmatmul.mubr.msk.bf16.vlgmr.msra.gmra.mxu1 %vm448_vm1, %v493_v31 }
 0x277   :  { %v563_v38 = vpop.f32.mrf.mxu1 }
 0x278   :  { %604 = vperm.xlu0 %975, %v563_v38  }
 0x279   :  { %v969_v39 = vpop.f32.mrf.mxu1 }
 0x27b   :  { %v566_v40 = vpop.f32.mrf.mxu1 }
 0x27d   :  { %v970_v41 = vpop.f32.mrf.mxu1 }
 0x2f3   :  { %v605_v43 = vpop.permute.xlu0 %604 }
 0x2f4   :  { %v763_v44 = vadd.f32 %v943_v36, %v605_v43 }
 0x2f6   :  { %v770_v45 = vadd.f32 %v769_v42, %v763_v44 }
 0x2f8   :  { %771 = vxpose.xlu0.b32.start.end [1/1] (short) (narrow) %v770_v45, 8 }
 0x374   :  { %v787_v46 = vpop.trf.xlu0 }
 0x375   :  { %804 = vst.msk [vmem:[%s1291_s9] sm:$0xff] %vm803_vm2, %v787_v46 }

</bundles_post_ra>
